<compile_context>
chip_gen: v5e
topology: v5e:2x2
jax: 0.10.0
libtpu: 0.0.40
codegen_flags: <defaults>
</compile_context>

<pallas_src>
import functools

import jax
import jax.numpy as jnp
from jax.experimental import pallas as pl
from jax.experimental.pallas import tpu as pltpu


def _round_up(n, m):
    return ((n + m - 1) // m) * m


def _layernorm_epilogue(y_lin, x_res, prm, inv_d, out_dtype):
    """bias + residual + LayerNorm over the (padded) last dim.

    prm rows: 0=b2, 1=gamma, 2=beta, 3=valid-lane mask (1.0 on the original
    D lanes, 0.0 on padding).  Padded lanes of y_lin/x_res/b2 are exactly 0,
    so sums over the padded width scaled by 1/D give the true statistics.
    """
    b2 = prm[0:1, :]
    gamma = prm[1:2, :]
    beta = prm[2:3, :]
    mask = prm[3:4, :]
    y = y_lin + b2 + x_res.astype(jnp.float32)
    mean = jnp.sum(y, axis=-1, keepdims=True) * inv_d
    c = y - mean
    # two-pass variance; mask removes the (Dp - D) * mean^2 padding term
    var = jnp.sum(c * c * mask, axis=-1, keepdims=True) * inv_d
    inv = jax.lax.rsqrt(var + 1e-6)
    return (c * inv * gamma + beta).astype(out_dtype)


def _ffn_kernel_resident(x_ref, w1_ref, b1_ref, w2_ref, prm_ref, o_ref, *, inv_d):
    """Weights fully VMEM-resident; 1-D grid over row tiles."""
    x = x_ref[...]
    xb = x.astype(jnp.bfloat16)
    h = jnp.dot(xb, w1_ref[...], preferred_element_type=jnp.float32) + b1_ref[...]
    h = jnp.maximum(h, 0.0)
    y = jnp.dot(h.astype(jnp.bfloat16), w2_ref[...],
                preferred_element_type=jnp.float32)
    o_ref[...] = _layernorm_epilogue(y, x, prm_ref[...], inv_d, o_ref.dtype)


def _ffn_kernel_chunked(x_ref, w1_ref, b1_ref, w2_ref, prm_ref, o_ref,
                        acc_ref, xb_ref, *, inv_d):
    """Hidden dim streamed in chunks; 2-D grid (row tiles, hidden chunks)."""
    k = pl.program_id(1)
    nk = pl.num_programs(1)

    # Hoist the f32 -> bf16 cast of the block-resident x tile out of the k loop.
    @pl.when(k == 0)
    def _():
        xb_ref[...] = x_ref[...].astype(jnp.bfloat16)

    h = jnp.dot(xb_ref[...], w1_ref[...],
                preferred_element_type=jnp.float32) + b1_ref[...]
    h = jnp.maximum(h, 0.0)
    part = jnp.dot(h.astype(jnp.bfloat16), w2_ref[...],
                   preferred_element_type=jnp.float32)

    # Direct store on the first chunk (no zero-init read-modify-write).
    @pl.when(k == 0)
    def _():
        acc_ref[...] = part

    @pl.when(k > 0)
    def _():
        acc_ref[...] += part

    @pl.when(k == nk - 1)
    def _():
        o_ref[...] = _layernorm_epilogue(acc_ref[...], x_ref[...],
                                         prm_ref[...], inv_d, o_ref.dtype)


def feedforward_pallas(x, w1, b1, w2, b2, gamma, beta, *,
                       block_rows=512, block_k=2048,
                       force_chunked=False):
    """x: (..., D).  w1: (D, H), b1: (H,), w2: (H, D), b2/gamma/beta: (D,).
    Returns the same shape and dtype as x."""
    orig_shape = x.shape
    orig_dtype = x.dtype
    D = orig_shape[-1]
    H = w1.shape[1]

    x2 = x.reshape(-1, D)
    N = x2.shape[0]

    # ---- padded feature dims (lane-dense; 256 on the hidden dim for full MXU
    #      fill on v6e/v7x) --------------------------------------------------
    Dp = _round_up(D, 128)
    Hp = _round_up(H, 256)

    # ---- row tile: large by default, but guarantee >= 2 row tiles so both
    #      TensorCores get work on v7x --------------------------------------
    tm = min(block_rows, _round_up(N, 8))
    if N > 8:
        tm = min(tm, _round_up((N + 1) // 2, 8))
    tm = max(_round_up(tm, 8), 8)

    # ---- per-generation VMEM budget ----------------------------------------
    try:
        vmem_cap = int(getattr(pltpu.get_tpu_info(), "vmem_capacity_bytes",
                               64 << 20))
    except Exception:  # pragma: no cover - conservative fallback (fits v7x)
        vmem_cap = 64 << 20
    vmem_budget = int(vmem_cap * 0.8)

    w_bytes = 2 * Dp * Hp * 2                      # bf16 w1 + w2, single copy

    def _resident_footprint(tm_):
        return (2 * w_bytes                        # weights (assume 2 buffers)
                + 2 * Hp * 4 + 2 * 4 * Dp * 4      # b1 + packed params
                + 4 * tm_ * Dp * 4                 # x + out tiles (2 bufs each)
                + tm_ * Hp * 4                     # hidden activation temp
                + 2 * tm_ * Dp * 4)                # epilogue / spill headroom

    use_resident = False
    if not force_chunked:
        tm_try = tm
        while True:
            if _resident_footprint(tm_try) <= vmem_budget:
                use_resident = True
                tm = tm_try
                break
            if tm_try <= 256:
                break
            tm_try = max(_round_up(tm_try // 2, 8), 8)

    n_row_tiles = -(-N // tm)                      # cdiv; partial last tile OK

    if use_resident:
        tk = Hp
    else:
        tk = min(_round_up(block_k, 256), Hp)
        while Hp % tk != 0:                        # Hp is a multiple of 256
            tk -= 256
        tk = max(tk, 256)

    # ---- activations: skip the padded copy when D is already lane-aligned --
    need_feat_pad = (Dp != D)
    if need_feat_pad:
        xp = jnp.zeros((N, Dp), jnp.float32).at[:, :D].set(x2.astype(jnp.float32))
    else:
        xp = x2

    # ---- padded / bf16 parameters ------------------------------------------
    w1p = jnp.zeros((Dp, Hp), jnp.bfloat16).at[:D, :H].set(w1.astype(jnp.bfloat16))
    w2p = jnp.zeros((Hp, Dp), jnp.bfloat16).at[:H, :D].set(w2.astype(jnp.bfloat16))
    b1p = jnp.zeros((1, Hp), jnp.float32).at[0, :H].set(b1.astype(jnp.float32))
    prm = jnp.zeros((4, Dp), jnp.float32)
    prm = prm.at[0, :D].set(b2.astype(jnp.float32))
    prm = prm.at[1, :D].set(gamma.astype(jnp.float32))
    prm = prm.at[2, :D].set(beta.astype(jnp.float32))
    prm = prm.at[3, :D].set(1.0)                   # valid-lane mask

    # ---- advisory cost estimate (weights re-read per row tile if streamed) --
    weight_passes = 1 if use_resident else n_row_tiles
    x_bytes = int(xp.size) * xp.dtype.itemsize
    out_bytes = N * Dp * jnp.dtype(orig_dtype).itemsize
    cost = pl.CostEstimate(
        flops=4 * N * D * H,
        transcendentals=N,
        bytes_accessed=int(x_bytes + out_bytes + weight_passes * w_bytes
                           + (Hp + 4 * Dp) * 4),
    )
    compiler_params = pltpu.CompilerParams(
        dimension_semantics=("parallel",) if use_resident
        else ("parallel", "arbitrary"),
        vmem_limit_bytes=vmem_budget,
    )

    if use_resident:
        kernel = functools.partial(_ffn_kernel_resident, inv_d=1.0 / D)
        out = pl.pallas_call(
            kernel,
            out_shape=jax.ShapeDtypeStruct((N, Dp), orig_dtype),
            grid_spec=pltpu.PrefetchScalarGridSpec(
                num_scalar_prefetch=0,
                grid=(n_row_tiles,),
                in_specs=[
                    pl.BlockSpec((tm, Dp), lambda i: (i, 0)),   # x rows
                    pl.BlockSpec((Dp, Hp), lambda i: (0, 0)),   # w1 (resident)
                    pl.BlockSpec((1, Hp), lambda i: (0, 0)),    # b1
                    pl.BlockSpec((Hp, Dp), lambda i: (0, 0)),   # w2 (resident)
                    pl.BlockSpec((4, Dp), lambda i: (0, 0)),    # b2/gamma/beta/mask
                ],
                out_specs=pl.BlockSpec((tm, Dp), lambda i: (i, 0)),
            ),
            compiler_params=compiler_params,
            cost_estimate=cost,
        )(xp, w1p, b1p, w2p, prm)
    else:
        kernel = functools.partial(_ffn_kernel_chunked, inv_d=1.0 / D)
        out = pl.pallas_call(
            kernel,
            out_shape=jax.ShapeDtypeStruct((N, Dp), orig_dtype),
            grid_spec=pltpu.PrefetchScalarGridSpec(
                num_scalar_prefetch=0,
                grid=(n_row_tiles, Hp // tk),
                in_specs=[
                    pl.BlockSpec((tm, Dp), lambda i, k: (i, 0)),  # x rows
                    pl.BlockSpec((Dp, tk), lambda i, k: (0, k)),  # w1 chunk
                    pl.BlockSpec((1, tk), lambda i, k: (0, k)),   # b1 chunk
                    pl.BlockSpec((tk, Dp), lambda i, k: (k, 0)),  # w2 chunk
                    pl.BlockSpec((4, Dp), lambda i, k: (0, 0)),   # params
                ],
                out_specs=pl.BlockSpec((tm, Dp), lambda i, k: (i, 0)),
                scratch_shapes=[
                    pltpu.VMEM((tm, Dp), jnp.float32),   # f32 accumulator
                    pltpu.VMEM((tm, Dp), jnp.bfloat16),  # hoisted bf16 x tile
                ],
            ),
            compiler_params=compiler_params,
            cost_estimate=cost,
        )(xp, w1p, b1p, w2p, prm)

    if need_feat_pad:
        out = out[:, :D]
    return out.reshape(orig_shape)


def _reference(x, w1, b1, w2, b2, gamma, beta):
    h = jnp.maximum(x @ w1 + b1, 0.0)
    y = h @ w2 + b2 + x
    mean = jnp.mean(y, axis=-1, keepdims=True)
    var = jnp.mean((y - mean) ** 2, axis=-1, keepdims=True)
    return (y - mean) / jnp.sqrt(var + 1e-6) * gamma + beta


def _make_params(key, in_dim, hidden_dim, batch, seq):
    kx, kw1, kb1, kw2, kb2 = jax.random.split(key, 5)
    x = jax.random.normal(kx, (batch, seq, in_dim), dtype=jnp.float32)
    bound1 = 1.0 / jnp.sqrt(in_dim)
    bound2 = 1.0 / jnp.sqrt(hidden_dim)
    w1 = jax.random.uniform(kw1, (in_dim, hidden_dim), jnp.float32, -bound1, bound1)
    b1 = jax.random.uniform(kb1, (hidden_dim,), jnp.float32, -bound1, bound1)
    w2 = jax.random.uniform(kw2, (hidden_dim, in_dim), jnp.float32, -bound2, bound2)
    b2 = jax.random.uniform(kb2, (in_dim,), jnp.float32, -bound2, bound2)
    gamma = jnp.ones((in_dim,), jnp.float32)   # LayerNorm weight init
    beta = jnp.zeros((in_dim,), jnp.float32)   # LayerNorm bias init
    return x, w1, b1, w2, b2, gamma, beta


if __name__ == "__main__":
    key = jax.random.PRNGKey(0)
    k_a, k_b = jax.random.split(key, 2)

    # --- case A: module-implied small shapes; exercises the weight-resident
    #     path and the feature-padding path (D=32 -> Dp=128). ----------------
    batch, seq, in_dim, hidden_dim = 2, 8, 32, 64
    args_a = _make_params(k_a, in_dim, hidden_dim, batch, seq)
    out_a = jax.block_until_ready(feedforward_pallas(*args_a))
    ref_a = _reference(*args_a)
    assert out_a.shape == args_a[0].shape and out_a.dtype == args_a[0].dtype
    # bf16 MXU operands with f32 accumulation: tolerance loosened vs f32 ref.
    assert jnp.allclose(out_a, ref_a, atol=5e-2, rtol=5e-2), "resident mismatch"

    # --- case B: lane-aligned D, multi-chunk hidden dim; exercises the
    #     streamed (chunked) path with accumulator + bf16 x scratch. ---------
    batch, seq, in_dim, hidden_dim = 2, 8, 128, 512
    args_b = _make_params(k_b, in_dim, hidden_dim, batch, seq)
    out_b = jax.block_until_ready(
        feedforward_pallas(*args_b, block_k=256, force_chunked=True))
    ref_b = _reference(*args_b)
    assert out_b.shape == args_b[0].shape and out_b.dtype == args_b[0].dtype
    assert jnp.allclose(out_b, ref_b, atol=5e-2, rtol=5e-2), "chunked mismatch"

    print("KERNEL_OK")
</pallas_src>

<mosaic_0001>
module attributes {stable_mosaic.version = 11 : i64} {
  func.func @_ffn_kernel_resident(%arg0: i32, %arg1: memref<8x128xf32, #tpu.memory_space<vmem>>, %arg2: memref<128x256xbf16, #tpu.memory_space<vmem>>, %arg3: memref<1x256xf32, #tpu.memory_space<vmem>>, %arg4: memref<256x128xbf16, #tpu.memory_space<vmem>>, %arg5: memref<4x128xf32, #tpu.memory_space<vmem>>, %arg6: memref<8x128xf32, #tpu.memory_space<vmem>>) attributes {dimension_semantics = [#tpu.dimension_semantics<parallel>], iteration_bounds = array<i64: 2>, scalar_prefetch = 0 : i64, scratch_operands = 0 : i64, tpu.core_type = #tpu.core_type<tc>, window_params = [{transform_indices = @transform_0, window_bounds = array<i64: 8, 128>}, {pipeline_mode = #tpu.pipeline_mode<synchronous>, transform_indices = @transform_1, window_bounds = array<i64: 128, 256>}, {pipeline_mode = #tpu.pipeline_mode<synchronous>, transform_indices = @transform_2, window_bounds = array<i64: 1, 256>}, {pipeline_mode = #tpu.pipeline_mode<synchronous>, transform_indices = @transform_3, window_bounds = array<i64: 256, 128>}, {pipeline_mode = #tpu.pipeline_mode<synchronous>, transform_indices = @transform_4, window_bounds = array<i64: 4, 128>}, {transform_indices = @transform_5, window_bounds = array<i64: 8, 128>}]} {
    %c0 = arith.constant 0 : index
    %c0_0 = arith.constant 0 : index
    %0 = vector.load %arg1[%c0, %c0_0] : memref<8x128xf32, #tpu.memory_space<vmem>>, vector<8x128xf32>
    %1 = arith.truncf %0 : vector<8x128xf32> to vector<8x128xbf16>
    %c0_1 = arith.constant 0 : index
    %c0_2 = arith.constant 0 : index
    %2 = vector.load %arg2[%c0_1, %c0_2] : memref<128x256xbf16, #tpu.memory_space<vmem>>, vector<128x256xbf16>
    %cst = arith.constant dense<0.000000e+00> : vector<8x256xf32>
    %3 = tpu.matmul %1, %2, %cst {dimension_numbers = #tpu.dot_dimension_numbers<[1], [0], [0], [1], [0, 0, 1, 1], [], []>} : vector<8x128xbf16>, vector<128x256xbf16>, vector<8x256xf32> -> vector<8x256xf32>
    %c0_3 = arith.constant 0 : index
    %c0_4 = arith.constant 0 : index
    %4 = vector.load %arg3[%c0_3, %c0_4] : memref<1x256xf32, #tpu.memory_space<vmem>>, vector<1x256xf32>
    %5 = vector.broadcast %4 : vector<1x256xf32> to vector<8x256xf32>
    %6 = arith.addf %3, %5 : vector<8x256xf32>
    %cst_5 = arith.constant 0.000000e+00 : f32
    %7 = vector.broadcast %cst_5 : f32 to vector<8x256xf32>
    %8 = arith.maximumf %6, %7 : vector<8x256xf32>
    %9 = arith.truncf %8 : vector<8x256xf32> to vector<8x256xbf16>
    %c0_6 = arith.constant 0 : index
    %c0_7 = arith.constant 0 : index
    %10 = vector.load %arg4[%c0_6, %c0_7] : memref<256x128xbf16, #tpu.memory_space<vmem>>, vector<256x128xbf16>
    %cst_8 = arith.constant dense<0.000000e+00> : vector<8x128xf32>
    %11 = tpu.matmul %9, %10, %cst_8 {dimension_numbers = #tpu.dot_dimension_numbers<[1], [0], [0], [1], [0, 0, 1, 1], [], []>} : vector<8x256xbf16>, vector<256x128xbf16>, vector<8x128xf32> -> vector<8x128xf32>
    %c0_9 = arith.constant 0 : index
    %c0_10 = arith.constant 0 : index
    %12 = vector.load %arg5[%c0_9, %c0_10] : memref<4x128xf32, #tpu.memory_space<vmem>>, vector<4x128xf32>
    %13 = vector.extract_strided_slice %12 {offsets = [0, 0], sizes = [1, 128], strides = [1, 1]} : vector<4x128xf32> to vector<1x128xf32>
    %14 = vector.extract_strided_slice %12 {offsets = [1, 0], sizes = [1, 128], strides = [1, 1]} : vector<4x128xf32> to vector<1x128xf32>
    %15 = vector.extract_strided_slice %12 {offsets = [2, 0], sizes = [1, 128], strides = [1, 1]} : vector<4x128xf32> to vector<1x128xf32>
    %16 = vector.extract_strided_slice %12 {offsets = [3, 0], sizes = [1, 128], strides = [1, 1]} : vector<4x128xf32> to vector<1x128xf32>
    %17 = vector.broadcast %13 : vector<1x128xf32> to vector<8x128xf32>
    %18 = arith.addf %11, %17 : vector<8x128xf32>
    %19 = arith.addf %18, %0 : vector<8x128xf32>
    %cst_11 = arith.constant dense<0.000000e+00> : vector<8xf32>
    %20 = vector.multi_reduction <add>, %19, %cst_11 [1] : vector<8x128xf32> to vector<8xf32>
    %21 = vector.shape_cast %20 : vector<8xf32> to vector<8x1xf32>
    %cst_12 = arith.constant 3.125000e-02 : f32
    %22 = vector.broadcast %cst_12 : f32 to vector<8x1xf32>
    %23 = arith.mulf %21, %22 : vector<8x1xf32>
    %24 = vector.broadcast %23 : vector<8x1xf32> to vector<8x128xf32>
    %25 = arith.subf %19, %24 : vector<8x128xf32>
    %26 = arith.mulf %25, %25 : vector<8x128xf32>
    %27 = vector.broadcast %16 : vector<1x128xf32> to vector<8x128xf32>
    %28 = arith.mulf %26, %27 : vector<8x128xf32>
    %cst_13 = arith.constant dense<0.000000e+00> : vector<8xf32>
    %29 = vector.multi_reduction <add>, %28, %cst_13 [1] : vector<8x128xf32> to vector<8xf32>
    %30 = vector.shape_cast %29 : vector<8xf32> to vector<8x1xf32>
    %cst_14 = arith.constant 3.125000e-02 : f32
    %31 = vector.broadcast %cst_14 : f32 to vector<8x1xf32>
    %32 = arith.mulf %30, %31 : vector<8x1xf32>
    %cst_15 = arith.constant 9.99999997E-7 : f32
    %33 = vector.broadcast %cst_15 : f32 to vector<8x1xf32>
    %34 = arith.addf %32, %33 : vector<8x1xf32>
    %35 = math.rsqrt %34 : vector<8x1xf32>
    %36 = vector.broadcast %35 : vector<8x1xf32> to vector<8x128xf32>
    %37 = arith.mulf %25, %36 : vector<8x128xf32>
    %38 = vector.broadcast %14 : vector<1x128xf32> to vector<8x128xf32>
    %39 = arith.mulf %37, %38 : vector<8x128xf32>
    %40 = vector.broadcast %15 : vector<1x128xf32> to vector<8x128xf32>
    %41 = arith.addf %39, %40 : vector<8x128xf32>
    %c0_16 = arith.constant 0 : index
    %c0_17 = arith.constant 0 : index
    %42 = vector.load %arg6[%c0_16, %c0_17] : memref<8x128xf32, #tpu.memory_space<vmem>>, vector<8x128xf32>
    tpu.vector_store %arg6[%c0_16, %c0_17], %41 {strides = array<i32>} : memref<8x128xf32, #tpu.memory_space<vmem>>, vector<8x128xf32>,
    return
  }
  func.func @transform_0(%arg0: i32) -> (i32, i32) {
    %c0_i32 = arith.constant 0 : i32
    %c0_i32_0 = arith.constant 0 : i32
    return %arg0, %c0_i32 : i32, i32
  }
  func.func @transform_1(%arg0: i32) -> (i32, i32) {
    %c0_i32 = arith.constant 0 : i32
    %c0_i32_0 = arith.constant 0 : i32
    %c0_i32_1 = arith.constant 0 : i32
    return %c0_i32, %c0_i32_0 : i32, i32
  }
  func.func @transform_2(%arg0: i32) -> (i32, i32) {
    %c0_i32 = arith.constant 0 : i32
    %c0_i32_0 = arith.constant 0 : i32
    %c0_i32_1 = arith.constant 0 : i32
    return %c0_i32, %c0_i32_0 : i32, i32
  }
  func.func @transform_3(%arg0: i32) -> (i32, i32) {
    %c0_i32 = arith.constant 0 : i32
    %c0_i32_0 = arith.constant 0 : i32
    %c0_i32_1 = arith.constant 0 : i32
    return %c0_i32, %c0_i32_0 : i32, i32
  }
  func.func @transform_4(%arg0: i32) -> (i32, i32) {
    %c0_i32 = arith.constant 0 : i32
    %c0_i32_0 = arith.constant 0 : i32
    %c0_i32_1 = arith.constant 0 : i32
    return %c0_i32, %c0_i32_0 : i32, i32
  }
  func.func @transform_5(%arg0: i32) -> (i32, i32) {
    %c0_i32 = arith.constant 0 : i32
    %c0_i32_0 = arith.constant 0 : i32
    return %arg0, %c0_i32 : i32, i32
  }
}

</mosaic_0001>

<bundles_post_ra>
// kernel: tpu_custom_call.1
= control target key start
LH: loop header
LB: loop body
LE: loop exit
PB: predicated region body
PF: predicated region fallthrough
CT: control target
= control target key end

     0   :  { %10 = vsyncpa [#allocation3], 0  ;;  %s1457_s0 = inlined_call_operand.hbm [shape: f32[16,128], index: 0, kind: input, shape index: {}]   ;;  %s1458_s1 = inlined_call_operand.hbm [shape: bf16[128,256], index: 1, kind: input, shape index: {}]   ;;  %s1459_s2 = inlined_call_operand.hbm [shape: f32[1,256], index: 2, kind: input, shape index: {}]   ;;  %s1460_s3 = inlined_call_operand.hbm [shape: bf16[256,128], index: 3, kind: input, shape index: {}]   ;;  %s1461_s4 = inlined_call_operand.hbm [shape: f32[4,128], index: 4, kind: input, shape index: {}]   ;;  %s1462_s5 = inlined_call_operand.hbm [shape: f32[16,128], index: 5, kind: output, shape index: {}]  }
   0x1   :  { %12 = vsyncpa [#allocation3 + $0x1], 0 }
   0x2   :  { %13 = vsyncpa [#allocation6], 0 }
   0x3   :  { %14 = vsyncpa [#allocation9], 0 }
   0x4   :  { %15 = vsyncpa [#allocation4], 0 }
   0x5   :  { %17 = vsyncpa [#allocation4 + $0x1], 0  ;;  %s1283_s18 = smov 0   ;;  %s1285_s19 = smov 0  }
   0x6   :  { %s1287_s20 = smov 0   ;;  %s1289_s21 = smov 0  }
   0x7 LB: > { %s175_s24 = sshll.u32 %s1458_s1, 4  ;;  %s1307_s25 = sadd.s32 4294967295, %s1243_s21   ;;  %s1243_s21 = sphi %s1289_s21, %s1474_s21   ;;  %s1239_s20 = sphi %s1287_s20, %s1473_s20   ;;  %s1235_s19 = sphi %s1285_s19, %s1472_s19   ;;  %s1231_s18 = sphi %s1283_s18, %s1471_s18   ;;  %s176_s24 = int_to_ptr.hbm [resolvable:$true] %s175_s24 }
   0x8   : > { %p747_p0 = scmp.ge.s32.totalorder %s1243_s21, 1  ;;  %p44_p1 = scmp.eq.s32.totalorder %s1307_s25, 0 }
   0x9   : > { %p164_p2 = scmp.lt.s32.totalorder %s1243_s21, 3  ;;  %s1245_s27 = smov [#allocation5]  }
   0xa   : > { %s177_s28 = sshll.u32 %s1245_s27, 4  ;;  %s201_s6 = sshll.u32 %s1460_s3, 4  ;;  %s178_s28 = int_to_ptr.vmem [resolvable:$true] %s177_s28  ;;  %s202_s6 = int_to_ptr.hbm [resolvable:$true] %s201_s6 }
   0xb   : > { %p1312_p3 = pnand %p747_p0, %p164_p2  ;;  %s1246_s8 = smov [#allocation8]  }
   0xc   : > { %s203_s9 = sshll.u32 %s1246_s8, 4  ;;  %s1247_s10 = smov 128   ;;  %s204_s9 = int_to_ptr.vmem [resolvable:$true] %s203_s9 }
   0xd   : > { %p946_p4 = pneg %p1312_p3  ;;  %s1248_s11 = smov 8  }
   0xe   : > { %s1249_s12 = smov 64   ;;  %s1250_s13 = smov 4  }
   0xf   : > { %p1324_p6 = pnand %p946_p4, %p44_p1  ;;  %s190_s16 = sshll.u32 %s1459_s2, 4  ;;  %s191_s16 = int_to_ptr.hbm [resolvable:$true] %s190_s16 }
  0x10   : > { %s1251_s17 = smov [#allocation7]   ;;  %s216_s27 = sshll.u32 %s1461_s4, 4  ;;  %s217_s27 = int_to_ptr.hbm [resolvable:$true] %s216_s27 }
  0x11   : > { %949 = dma.hbm_to_vmem [thread:$0]  (!%p1324_p6), %s176_s24, 2048, %s178_s28, [#allocation6], %s1247_s10, %s1247_s10, %s1248_s11  }
  0x12   : > { %955 = dma.hbm_to_vmem [thread:$0]  (!%p1324_p6), %s202_s6, 2048, %s204_s9, [#allocation9], %s1249_s12, %s1249_s12, %s1250_s13  }
  0x13   : > { %s192_s22 = sshll.u32 %s1251_s17, 4  ;;  %s1252_s28 = smov [#allocation10]   ;;  %s193_s22 = int_to_ptr.vmem [resolvable:$true] %s192_s22 }
  0x14   : > { %952 = dma.hbm_to_vmem [thread:$0]  (!%p1324_p6), %s191_s16, 32, %s193_s22, [#allocation6]  }
  0x15   : > { %s218_s29 = sshll.u32 %s1252_s28, 4  ;;  %s746_s30 = sadd.s32 4294967294, %s1243_s21   ;;  %s219_s29 = int_to_ptr.vmem [resolvable:$true] %s218_s29 }
  0x16   : > { %958 = dma.hbm_to_vmem [thread:$0]  (!%p1324_p6), %s217_s27, 64, %s219_s29, [#allocation9]  }
  0x17   : > { %s1344_s6 = sadd.s32 1, %s1243_s21   ;;  %s30_s9 = sadd.s32 1, %s1239_s20 }
  0x18   : > { %s27_s8 = ssub.s32 %s1243_s21, %s1344_s6  ;;  %p37_p8 = scmp.ne.s32.totalorder %s1239_s20, %s1235_s19 }
  0x19   : > { %p28_p7 = scmp.eq.s32.totalorder %s27_s8, 0  ;;  %p38_p9 = scmp.eq.s32.totalorder %s1243_s21, 0 }
  0x1a   : > { %p43_p10 = scmp.ne.s32.totalorder %s1235_s19, %s1231_s18  ;;  %p151_p13 = scmp.eq.s32.totalorder %s1307_s25, 1 }
  0x1b   : > { %s1355_s10 = scalar_select %p28_p7, %s1239_s20, %s30_s9  }
  0x1c   : > { %p1357_p11 = por %p38_p9, %p37_p8  ;;  %p1363_p12 = por %p44_p1, %p43_p10 }
  0x1d   : > { %p157_p0 = scmp.eq.s32.totalorder %s746_s30, 1  ;;  %p971_p2 = scmp.lt.s32.totalorder %s1243_s21, 2 }
  0x1e   : > { %s229_s12 = sand.u32 1, %s1239_s20   ;;  %p1370_p4 = por %p151_p13, %p37_p8 }
  0x1f   : > { %p1374_p6 = por %p157_p0, %p43_p10  ;;  %s753_s15 = sshll.u32 %s229_s12, 3 }
  0x20   : > { %s754_s16 = sshll.u32 %s1243_s21, 3  ;;  %s233_s24 = scalar_lea.vmem [#allocation2], %s753_s15 }
  0x21   : > { %s237_s23 = scalar_lea.hbm %s1457_s0, %s754_s16  ;;  %s241_s27 = sshll.u32 %s233_s24, 4  ;;  %s242_s27 = int_to_ptr.vmem [resolvable:$true] %s241_s27 }
  0x22   : > { %s239_s28 = sshll.u32 %s237_s23, 4  ;;  %p1384_p7 = pnand %p971_p2, %p1357_p11  ;;  %s240_s28 = int_to_ptr.hbm [resolvable:$true] %s239_s28 }
  0x23   : > { %s230_s30 = scalar_lea.sflag [#allocation3], %s229_s12  ;;  %s1139_s8 = sshra.s32 %s240_s28, 4  ;;  %s1140_s8 = int_to_ptr.hbm [resolvable:$true] %s1139_s8 }
  0x24   : > { %s1141_s9 = scalar_lea.hbm %s1140_s8, 8  ;;  %p1143_p9 = pneg %p1384_p7 }
  0x25   : > { %p1142_p8 = scmp.ne.s32.totalorder %s1140_s8, %s1141_s9  ;;  %s1146_s17 = scalar_lea.hbm %s1457_s0, 16 }
  0x26   : > { %p1147_p11 = scmp.lt.s32.totalorder %s1140_s8, %s1457_s0  ;;  %p1148_p0 = scmp.lt.s32.totalorder %s1146_s17, %s1141_s9 }
  0x27   : > { %p1144_p10 = pnand %p1143_p9, %p1142_p8 }
  0x28   : > { %p1149_p2 = por %p1148_p0, %p1147_p11 }
  0x29   : > { %p1145_p13 = pneg %p1144_p10 }
  0x2b   : > { %p1150_p5 = pnand %p1149_p2, %p1145_p13 }
  0x2d   : > { %1153 = shalt.err (!%p1150_p5)
}
  0x2e   : > { %962 = dma.hbm_to_vmem [thread:$0]  (!%p1384_p7), %s240_s28, 128, %s242_s27, %s230_s30  }
  0x2f   : > { %250 = sbr.rel (%p1312_p3) target bundleno = 632 (0x278), region = 40  ;;  %s1401_s12 = sand.u32 (!%p1312_p3), 1, %s1235_s19  }
  0x30   : > { %s756_s23 = sshll.u32 (!%p1312_p3), %s1401_s12, 3  ;;  %s253_s24 = scalar_lea.sflag (!%p1312_p3), [#allocation3], %s1401_s12 }
  0x31   : > { %s1407_s8 = scalar_lea.vmem (!%p1312_p3), [#allocation2], %s756_s23 }
  0x34   : > { %1214 = dma.done.wait (%p1363_p12), %s253_s24, 128  }
  0x35   : > { %1216 = vsyncadd (%p1363_p12), %s253_s24, 4294967168 }
  0x36   : > { %1218 = dma.done.wait (%p44_p1), [#allocation6], 2080  }
  0x37   : > { %1220 = vsyncadd (%p44_p1), [#allocation6], 4294965216 }
  0x38   : > { %1222 = dma.done.wait (%p44_p1), [#allocation9], 2112  }
  0x39   : > { %1224 = vsyncadd (%p44_p1), [#allocation9], 4294965184  ;;  %v820_v0 = vld [vmem:[#allocation5 + $0x70] sm:$0xf]  ;;  %v909_v1 = vld [vmem:[#allocation5 + $0x74] sm:$0xf0] }
  0x3a   : > { %v908_v2 = vld [vmem:[#allocation5 + $0x74] sm:$0xf]  ;;  %v821_v3 = vor.u32 %v909_v1, %v820_v0  ;;  %v822_v4 = vld [vmem:[#allocation5 + $0x78] sm:$0xf0]  ;;  %v812_v5 = vld [vmem:[#allocation5 + $0x60] sm:$0xf] }
  0x3b   : > { %v907_v6 = vld [vmem:[#allocation5 + $0x64] sm:$0xf0]  ;;  %v825_v7 = vor.u32 %v908_v2, %v822_v4  ;;  %v906_v8 = vld [vmem:[#allocation5 + $0x64] sm:$0xf]  ;;  %v814_v9 = vld [vmem:[#allocation5 + $0x68] sm:$0xf0] }
  0x3c   : > { %408 = vmatpush.bf16.msra.mxu0 %v821_v3  ;;  %v813_v10 = vor.u32 %v907_v6, %v812_v5  ;;  %v817_v11 = vor.u32 %v906_v8, %v814_v9  ;;  %v804_v12 = vld [vmem:[#allocation5 + $0x50] sm:$0xf]  ;;  %v905_v13 = vld [vmem:[#allocation5 + $0x54] sm:$0xf0]  ;;  %v904_v14 = vld [vmem:[#allocation5 + $0x54] sm:$0xf] }
  0x3d   : > { %421 = vmatpush.bf16.msra.mxu1 %v825_v7  ;;  %v806_v15 = vld [vmem:[#allocation5 + $0x58] sm:$0xf0]  ;;  %v805_v16 = vor.u32 %v905_v13, %v804_v12  ;;  %v796_v18 = vld [vmem:[#allocation5 + $0x40] sm:$0xf]  ;;  %v903_v19 = vld [vmem:[#allocation5 + $0x44] sm:$0xf0] }
  0x3e   : > { %v809_v17 = vor.u32 %v904_v14, %v806_v15  ;;  %v902_v20 = vld [vmem:[#allocation5 + $0x44] sm:$0xf]  ;;  %v798_v21 = vld [vmem:[#allocation5 + $0x48] sm:$0xf0]  ;;  %v797_v22 = vor.u32 %v903_v19, %v796_v18  ;;  %v917_v23 = vld [vmem:[#allocation8 + $0x38] sm:$0xff]  ;;  %s891_s26 = sshll.u32 %s1307_s25, 3 }
  0x3f   : > { %v925_v24 = vld [vmem:[#allocation8 + $0x78] sm:$0xff]  ;;  %v801_v25 = vor.u32 %v902_v20, %v798_v21  ;;  %v788_v26 = vld [vmem:[#allocation5 + $0x30] sm:$0xf]  ;;  %v900_v28 = vld [vmem:[#allocation5 + $0x34] sm:$0xf]  ;;  %568 = vmatpush.bf16.msra.mxu2 %v917_v23  ;;  %s633_s28 = scalar_lea.hbm %s1462_s5, %s891_s26  ;;  %s303_s29 = scalar_lea.vmem [#allocation11], %s756_s23 }
  0x40   : > { %409 = vmatpush.bf16.msra.mxu0 %v813_v10  ;;  %v901_v27 = vld [vmem:[#allocation5 + $0x34] sm:$0xf0]  ;;  %v790_v29 = vld [vmem:[#allocation5 + $0x38] sm:$0xf0]  ;;  %581 = vmatpush.bf16.msra.mxu3 %v925_v24  ;;  %v780_v34 = vld [vmem:[#allocation5 + $0x20] sm:$0xf] }
  0x41   : > { %422 = vmatpush.bf16.msra.mxu1 %v817_v11  ;;  %v916_v30 = vld [vmem:[#allocation8 + $0x30] sm:$0xff]  ;;  %v789_v32 = vor.u32 %v901_v27, %v788_v26  ;;  %v793_v33 = vor.u32 %v900_v28, %v790_v29  ;;  %v899_v35 = vld [vmem:[#allocation5 + $0x24] sm:$0xf0]  ;;  %v898_v36 = vld [vmem:[#allocation5 + $0x24] sm:$0xf]  ;;  %s635_s30 = sshll.u32 %s303_s29, 4  ;;  %s636_s30 = int_to_ptr.vmem [resolvable:$true] %s635_s30 }
  0x42   : > { %v924_v31 = vld [vmem:[#allocation8 + $0x70] sm:$0xff]  ;;  %v782_v37 = vld [vmem:[#allocation5 + $0x28] sm:$0xf0]  ;;  %v781_v40 = vor.u32 %v899_v35, %v780_v34  ;;  %v774_v45 = vld [vmem:[#allocation5 + $0x18] sm:$0xf0]  ;;  %s637_s9 = sshll.u32 %s633_s28, 4  ;;  %s638_s9 = int_to_ptr.hbm [resolvable:$true] %s637_s9 }
  0x43   : > { %569 = vmatpush.bf16.msra.mxu2 %v916_v30  ;;  %v915_v38 = vld [vmem:[#allocation8 + $0x28] sm:$0xff]  ;;  %v785_v41 = vor.u32 %v898_v36, %v782_v37  ;;  %v897_v43 = vld [vmem:[#allocation5 + $0x14] sm:$0xf0]  ;;  %v896_v44 = vld [vmem:[#allocation5 + $0x14] sm:$0xf]  ;;  %s623_s25 = scalar_lea.sflag [#allocation4], %s1401_s12 }
  0x44   : > { %410 = vmatpush.bf16.msra.mxu0 %v805_v16  ;;  %582 = vmatpush.bf16.msra.mxu3 %v924_v31  ;;  %v923_v39 = vld [vmem:[#allocation8 + $0x68] sm:$0xff]  ;;  %v914_v46 = vld [vmem:[#allocation8 + $0x20] sm:$0xff]  ;;  %v777_v49 = vor.u32 %v896_v44, %v774_v45  ;;  %v913_v54 = vld [vmem:[#allocation8 + $0x18] sm:$0xff]  ;;  %s1183_s15 = sshra.s32 %s638_s9, 4  ;;  %s1189_s11 = scalar_lea.hbm %s1462_s5, 16  ;;  %s1184_s15 = int_to_ptr.hbm [resolvable:$true] %s1183_s15 }
  0x45   : > { %423 = vmatpush.bf16.msra.mxu1 %v809_v17  ;;  %v772_v42 = vld [vmem:[#allocation5 + $0x10] sm:$0xf]  ;;  %v922_v47 = vld [vmem:[#allocation8 + $0x60] sm:$0xff]  ;;  %v766_v53 = vld [vmem:[#allocation5 + $0x8] sm:$0xf0]  ;;  %s1185_s16 = scalar_lea.hbm %s1184_s15, 8  ;;  %p1190_p12 = scmp.lt.s32.totalorder %s1184_s15, %s1462_s5 }
  0x46   : > { %v773_v48 = vor.u32 %v897_v43, %v772_v42  ;;  %v764_v50 = vld [vmem:[#allocation5] sm:$0xf]  ;;  %v895_v51 = vld [vmem:[#allocation5 + $0x4] sm:$0xf0]  ;;  %v894_v52 = vld [vmem:[#allocation5 + $0x4] sm:$0xf]  ;;  %p1186_p1 = scmp.ne.s32.totalorder %s1184_s15, %s1185_s16  ;;  %p1191_p7 = scmp.lt.s32.totalorder %s1189_s11, %s1185_s16 }
  0x47   : > { %570 = vmatpush.bf16.msra.mxu2 %v915_v38  ;;  %v921_v55 = vld [vmem:[#allocation8 + $0x58] sm:$0xff]  ;;  %v765_v56 = vor.u32 %v895_v51, %v764_v50  ;;  %v769_v58 = vor.u32 %v894_v52, %v766_v53  ;;  %v912_v59 = vld [vmem:[#allocation8 + $0x10] sm:$0xff]  ;;  %v911_v62 = vld [vmem:[#allocation8 + $0x8] sm:$0xff] }
  0x48   : > { %411 = vmatpush.bf16.msra.mxu0 %v797_v22  ;;  %583 = vmatpush.bf16.msra.mxu3 %v923_v39  ;;  %v304_v57 = vld [vmem:[%s1407_s8] sm:$0xff]  ;;  %v910_v0 = vld [vmem:[#allocation8] sm:$0xff]  ;;  %v322_v2 = vld [vmem:[#allocation7] sm:$0x3]  ;;  %p1187_p3 = pnand %p1186_p1, %p1370_p4  ;;  %p1192_p8 = por %p1191_p7, %p1190_p12 }
  0x49   : > { %424 = vmatpush.bf16.msra.mxu1 %v801_v25  ;;  %v920_v60 = vld [vmem:[#allocation8 + $0x50] sm:$0xff]  ;;  %v305_v61 = vpack.c.bf16 %v304_v57, %v304_v57  ;;  %v919_v63 = vld [vmem:[#allocation8 + $0x48] sm:$0xff]  ;;  %v918_v1 = vld [vmem:[#allocation8 + $0x40] sm:$0xff]  ;;  %v324_v3 = vperm.slane %v322_v2, 0  ;;  %v325_v4 = vperm.slane %v322_v2, 1 }
  0x4a   : > { %v470_v15 = vld [vmem:[#allocation10] sm:$0xf]  ;;  %p1188_p5 = pneg %p1187_p3 }
  0x4b   : > { %571 = vmatpush.bf16.msra.mxu2 %v914_v46  ;;  %v471_v16 = vperm.slane %v470_v15, 0  ;;  %v600_v27 = vperm.slane %v470_v15, 3  ;;  %v617_v39 = vperm.slane %v470_v15, 1 }
  0x4c   : > { %412 = vmatpush.bf16.msra.mxu0 %v789_v32  ;;  %584 = vmatpush.bf16.msra.mxu3 %v922_v47  ;;  %p1193_p9 = pnand %p1192_p8, %p1188_p5 }
  0x4d   : > { %425 = vmatpush.bf16.msra.mxu1 %v793_v33 }
  0x4f   : > { %572 = vmatpush.bf16.msra.mxu2 %v913_v54 }
  0x50   : > { %413 = vmatpush.bf16.msra.mxu0 %v781_v40  ;;  %585 = vmatpush.bf16.msra.mxu3 %v921_v55 }
  0x51   : > { %426 = vmatpush.bf16.msra.mxu1 %v785_v41  ;;  %v619_v41 = vperm.slane %v470_v15, 2 }
  0x53   : > { %573 = vmatpush.bf16.msra.mxu2 %v912_v59 }
  0x54   : > { %414 = vmatpush.bf16.msra.mxu0 %v773_v48  ;;  %586 = vmatpush.bf16.msra.mxu3 %v920_v60 }
  0x55   : > { %427 = vmatpush.bf16.msra.mxu1 %v777_v49 }
  0x57   : > { %574 = vmatpush.bf16.msra.mxu2 %v911_v62 }
  0x58   : > { %415 = vmatpush.bf16.msra.mxu0 %v765_v56  ;;  %587 = vmatpush.bf16.msra.mxu3 %v919_v63 }
  0x59   : > { %428 = vmatpush.bf16.msra.mxu1 %v769_v58 }
  0x5b   : > { %416 = vmatmul.bf16.vlgmr.msra.gmra.mxu0 %v305_v61  ;;  %575 = vmatpush.bf16.msra.mxu2 %v910_v0 }
  0x5c   : > { %429 = vmatmul.bf16.vlgmr.msra.gmra.mxu1 %v305_v61  ;;  %588 = vmatpush.bf16.msra.mxu3 %v918_v1 }
  0xd8   : > { %v417_v5 = vpop.f32.mrf.mxu0 }
  0xd9   : > { %v418_v6 = vadd.f32 %v417_v5, %v324_v3  ;;  %v430_v7 = vpop.f32.mrf.mxu1 }
  0xda   : > { %v431_v8 = vadd.f32 %v430_v7, %v325_v4 }
  0xdb   : > { %v434_v9 = vmax.f32 %v418_v6, 0.0 }
  0xdc   : > { %v435_v10 = vmax.f32 %v431_v8, 0.0 }
  0xdd   : > { %v436_v11 = vpack.c.bf16 %v434_v9, %v434_v9 }
  0xde   : > { %v437_v12 = vpack.c.bf16 %v435_v10, %v435_v10 }
  0xdf   : > { %576 = vmatmul.bf16.vlgmr.msra.gmra.mxu2 %v436_v11 }
  0xe0   : > { %589 = vmatmul.bf16.vlgmr.msra.gmra.mxu3 %v437_v12  ;;  %v419_v13 = vpop.f32.mrf.mxu0 }
  0xe1   : > { %v432_v14 = vpop.f32.mrf.mxu1 }
 0x162   : > { %v577_v17 = vpop.f32.mrf.mxu2 }
 0x163   : > { %v578_v18 = vadd.f32 %v577_v17, %v471_v16  ;;  %v590_v19 = vpop.f32.mrf.mxu3 }
 0x165   : > { %v591_v20 = vadd.f32 %v590_v19, %v578_v18 }
 0x167   : > { %v594_v21 = vadd.f32 %v591_v20, %v304_v57 }
 0x169   : > { %595 = vadd.xlane.f32.xlu0 %v594_v21 }
 0x16a   : > { %v579_v22 = vpop.f32.mrf.mxu2 }
 0x16b   : > { %v592_v23 = vpop.f32.mrf.mxu3 }
 0x1dc   : > { %v596_v24 = vpop.xlane.xlu0 %595 }
 0x1dd   : > { %v597_v25 = vmul.f32 0.03125, %v596_v24 }
 0x1df   : > { %v598_v26 = vsub.f32 %v594_v21, %v597_v25 }
 0x1e1   : > { %v599_v28 = vmul.f32 %v598_v26, %v598_v26 }
 0x1e3   : > { %v601_v29 = vmul.f32 %v600_v27, %v599_v28 }
 0x1e5   : > { %602 = vadd.xlane.f32.xlu0 %v601_v29 }
 0x258   : > { %v603_v30 = vpop.xlane.xlu0 %602 }
 0x259   : > { %v604_v31 = vmul.f32 0.03125, %v603_v30 }
 0x25b   : > { %v605_v32 = vadd.f32 1e-06, %v604_v31 }
 0x25d   : > { %1017 = vrsqrt.f32 %v605_v32  ;;  %vm612_vm1 = vweird.f32 %v605_v32 }
 0x263   : > { %v1018_v33 = vpop.eup %1017 }
 0x264   : > { %v607_v34 = vmul.f32 %v1018_v33, %v605_v32  ;;  %vm613_vm0 = vweird.f32 %v1018_v33 }
 0x265   : > { %vm614_vm2 = vmor %vm612_vm1, %vm613_vm0 }
 0x266   : > { %v608_v35 = vmul.f32 %v1018_v33, %v607_v34 }
 0x268   : > { %v609_v36 = vmul.f32 0.5, %v608_v35 }
 0x26a   : > { %v610_v37 = vsub.f32 1.5, %v609_v36 }
 0x26c   : > { %v611_v38 = vmul.f32 %v1018_v33, %v610_v37 }
 0x26e   : > { %v615_v40 = vsel %vm614_vm2, %v1018_v33, %v611_v38 }
 0x26f   : > { %v616_v42 = vmul.f32 %v615_v40, %v598_v26 }
 0x271   : > { %v618_v43 = vmul.f32 %v617_v39, %v616_v42 }
 0x273   : > { %v620_v44 = vadd.f32 %v619_v41, %v618_v43 }
 0x275   : > { %621 = vst [vmem:[%s303_s29] sm:$0xff] %v620_v44 }
 0x276   : > { %1196 = shalt.err (!%p1193_p9)
}
 0x277   : > { %944 = dma.vmem_to_hbm [thread:$0]  (%p1370_p4), %s636_s30, 128, %s638_s9, %s623_s25  }
 0x278 PF: > { %s649_s12 = sand.u32 1, %s1231_s18   ;;  %p1470_p10 = scmp.ge.s32.totalorder %s1243_s21, 2 }
 0x279   : > { %s650_s8 = scalar_lea.sflag [#allocation4], %s649_s12 }
 0x27a   : > { %p964_p13 = pnand %p1470_p10, %p1374_p6 }
 0x27c   : > { %p965_p11 = pneg %p964_p13 }
 0x27e   : > { %1226 = dma.done.wait (%p965_p11), %s650_s8, 128  }
 0x27f   : > { %1228 = vsyncadd (%p965_p11), %s650_s8, 4294967168  ;;  %p20_p0 = scmp.ge.s32.totalorder %s1344_s6, 4   ;;  %s1471_s18 = smov %s1235_s19 }
 0x280   : > { %s1472_s19 = smov %s1239_s20  ;;  %s1473_s20 = smov %s1355_s10 }
 0x281   : > { %s1474_s21 = smov %s1344_s6  ;;  %22 = sbr.rel (!%p20_p0) target bundleno = 7 (0x7), region = 101 }
 0x286   :  { %656 = vsyncpa [#allocation3], 1 }
 0x287   :  { %658 = vsyncpa [#allocation3 + $0x1], 1 }
 0x288   :  { %659 = vsyncpa [#allocation6], 1 }
 0x289   :  { %660 = vsyncpa [#allocation9], 1 }
 0x28a   :  { %661 = vsyncpa [#allocation4], 1 }
 0x28b   :  { %663 = vsyncpa [#allocation4 + $0x1], 1 }

</bundles_post_ra>
